<compile_context>
chip_gen: v6e
topology: v6e:2x2x1
jax: 0.10.0
libtpu: 0.0.40
codegen_flags: <defaults>
</compile_context>

<pallas_src>
import functools

import jax
import jax.numpy as jnp
import numpy as np
from jax import lax
from jax.experimental import pallas as pl
from jax.experimental.pallas import tpu as pltpu

LANES = 128
TM_MAX = 4096        # max rows per DMA block (f32: 2 MiB/array, x2 arrays x2 buffers = 8 MiB)
CHUNK_ROWS = 64      # rows per in-kernel compute chunk (8 f32 vregs per temporary)
ROW_ALIGN = 16       # block sublane alignment that satisfies both f32 (8) and bf16 (16)
SCRUB_LOGIT = -1e9   # exp underflows, tanh saturates -> per-element loss is exactly 0


def _round_up(a, b):
    return (a + b - 1) // b * b


def _modulating(t, gamma):
    """(1 - p_t)**gamma without pow for the common gammas."""
    if gamma == 0.0:
        return None
    if gamma == 0.5:
        return jnp.sqrt(t)
    if gamma == 1.0:
        return t
    if gamma == 1.5:
        return t * jnp.sqrt(t)       # t**1.5: one EUP sqrt + one mul (no exp/log)
    if gamma == 2.0:
        return t * t
    return jnp.power(t, gamma)


def _focal_loss_kernel(pred_ref, true_ref, out_ref, *, n_valid, tm, chunk,
                       blocks_total, steps, skip_dup, gamma, alpha):
    par = pl.program_id(0)
    i = pl.program_id(1)
    # par==0 walks blocks front-to-back, par==1 back-to-front: always in range.
    block_idx = par * (blocks_total - 1) + i * (1 - 2 * par)

    @pl.when(i == 0)
    def _init():
        out_ref[...] = jnp.zeros_like(out_ref)

    # Scrub the tail of the final (partial) block: rows past the end of the
    # array hold stale VMEM garbage and the wrapper's <128-element lane pad is
    # arbitrary; overwrite both with a (logit, target) pair whose focal loss is
    # exactly zero, so the hot loop needs no per-element masking.
    if n_valid < blocks_total * tm * LANES:
        valid_in_last = n_valid - (blocks_total - 1) * tm * LANES  # static, > 0

        @pl.when(block_idx == blocks_total - 1)
        def _scrub():
            row = lax.broadcasted_iota(jnp.int32, (tm, LANES), 0)
            col = lax.broadcasted_iota(jnp.int32, (tm, LANES), 1)
            keep = (row * LANES + col) < valid_in_last
            pred_ref[...] = jnp.where(keep, pred_ref[...],
                                      jnp.asarray(SCRUB_LOGIT, pred_ref.dtype))
            true_ref[...] = jnp.where(keep, true_ref[...],
                                      jnp.zeros((), true_ref.dtype))

    c_af0 = 1.0 - alpha            # alpha_factor = c_af0 + c_af1 * y  (folded constants)
    c_af1 = 2.0 * alpha - 1.0

    def chunk_body(ci, acc):
        r0 = pl.multiple_of(ci * chunk, chunk)
        x = pred_ref[pl.ds(r0, chunk), :].astype(jnp.float32)
        y = true_ref[pl.ds(r0, chunk), :].astype(jnp.float32)

        e = jnp.exp(-jnp.abs(x))                                # EUP
        bce = jnp.maximum(x, 0.0) - x * y + jnp.log1p(e)        # stable BCE-with-logits
        p = 0.5 * jnp.tanh(0.5 * x) + 0.5                       # sigmoid via one EUP tanh
        t = (y + p) - 2.0 * (y * p)                             # == 1 - p_t
        af = c_af0 + c_af1 * y
        mod = _modulating(t, gamma)
        loss = bce * af if mod is None else bce * (af * mod)
        # Fold chunk rows onto 8 sublanes (pure VPU adds); running sum stays in
        # a single vreg carried through the fori_loop.
        return acc + jnp.sum(loss.reshape(-1, 8, LANES), axis=0)

    def accumulate():
        acc = lax.fori_loop(0, tm // chunk, chunk_body,
                            jnp.zeros((8, LANES), jnp.float32))
        out_ref[...] += acc

    if skip_dup:
        # Odd block count split over 2 cores: par==1's last step revisits a
        # block already handled by par==0 -> skip its accumulation.
        pl.when(jnp.logical_not(jnp.logical_and(par == 1, i == steps - 1)))(accumulate)
    else:
        accumulate()


def _num_tensorcores():
    """2 where a 'parallel' grid axis is sharded across 2 TensorCores."""
    try:
        kind = str(jax.devices()[0].device_kind).lower()
    except Exception:
        return 1
    return 2 if any(tag in kind for tag in ("v4", "v5p", "v7")) else 1


def focal_loss(pred, true, *, gamma=1.5, alpha=0.25, reduction="mean"):
    """FocalLoss(nn.BCEWithLogitsLoss())(pred, true) with 'mean'/'sum' reduction."""
    assert pred.shape == true.shape
    n = int(np.prod(pred.shape))
    assert 0 < n < 2 ** 31
    if reduction not in ("mean", "sum"):
        # TODO(synk): reduction='none' (full elementwise output) not implemented.
        raise NotImplementedError(reduction)

    # Free reshapes; NO dtype casts here (a standalone cast is its own HBM
    # pass) -- the kernel upcasts per-chunk in registers.
    flat_p = pred.reshape(-1)
    flat_t = true.reshape(-1)

    rem = n % LANES
    if rem:
        # Only non-multiple-of-128 sizes pay this one extra copy. Pad values
        # are irrelevant: the kernel scrubs every element index >= n.
        pad = LANES - rem
        flat_p = jnp.concatenate([flat_p, jnp.zeros((pad,), flat_p.dtype)])
        flat_t = jnp.concatenate([flat_t, jnp.zeros((pad,), flat_t.dtype)])
    rows = (n + LANES - 1) // LANES

    # ---- block sizing (right-sized to the problem) --------------------------
    num_par = _num_tensorcores()
    blocks_goal = -(-rows // TM_MAX)
    if num_par == 2 and rows >= 256:
        blocks_goal = max(blocks_goal, 2)            # keep both TensorCores busy
    tm0 = -(-rows // blocks_goal)
    align = CHUNK_ROWS if tm0 > CHUNK_ROWS else ROW_ALIGN
    tm = min(_round_up(tm0, align), _round_up(rows, align))
    blocks_total = -(-rows // tm)
    num_par = max(1, min(num_par, blocks_total))
    steps = -(-blocks_total // num_par)
    chunk = min(CHUNK_ROWS, tm)                      # tm % chunk == 0 by construction
    skip_dup = (num_par == 2) and (blocks_total % 2 == 1)

    p2 = flat_p.reshape(rows, LANES)
    t2 = flat_t.reshape(rows, LANES)

    kernel = functools.partial(
        _focal_loss_kernel, n_valid=n, tm=tm, chunk=chunk,
        blocks_total=blocks_total, steps=steps, skip_dup=skip_dup,
        gamma=float(gamma), alpha=float(alpha))

    def in_map(par, i):
        return (par * (blocks_total - 1) + i * (1 - 2 * par), 0)

    partial_sums = pl.pallas_call(
        kernel,
        out_shape=jax.ShapeDtypeStruct((num_par * 8, LANES), jnp.float32),
        grid_spec=pltpu.PrefetchScalarGridSpec(
            num_scalar_prefetch=0,
            grid=(num_par, steps),
            in_specs=[pl.BlockSpec((tm, LANES), in_map),
                      pl.BlockSpec((tm, LANES), in_map)],
            out_specs=pl.BlockSpec((8, LANES), lambda par, i: (par, 0)),
        ),
        compiler_params=pltpu.CompilerParams(
            # Inner axis revisits the same output block (accumulator) -> 'arbitrary';
            # outer axis owns disjoint partial-sum blocks -> megacore 'parallel'.
            dimension_semantics=("parallel", "arbitrary")),
    )(p2, t2)

    total = jnp.sum(partial_sums)
    if reduction == "mean":
        return total / jnp.float32(n)
    return total


def focal_loss_reference(pred, true, *, gamma=1.5, alpha=0.25):
    """Pure-JAX reference mirroring the PyTorch forward (for verification)."""
    x = pred.astype(jnp.float32)
    y = true.astype(jnp.float32)
    bce = jnp.maximum(x, 0.0) - x * y + jnp.log1p(jnp.exp(-jnp.abs(x)))
    p = jax.nn.sigmoid(x)
    p_t = y * p + (1.0 - y) * (1.0 - p)
    af = y * alpha + (1.0 - y) * (1.0 - alpha)
    return (bce * af * (1.0 - p_t) ** gamma).mean()


if __name__ == "__main__":
    key = jax.random.PRNGKey(0)
    k1, k2, k3, k4, k5, k6 = jax.random.split(key, 6)

    # 1) Small YOLO-head-like NCHW logits with {0,1} targets (single block).
    pred = jax.random.normal(k1, (2, 4, 16, 16), dtype=jnp.float32) * 2.0
    true = (jax.random.uniform(k2, (2, 4, 16, 16)) > 0.7).astype(jnp.float32)
    out = jax.block_until_ready(focal_loss(pred, true))
    ref = focal_loss_reference(pred, true)
    assert np.allclose(np.asarray(out), np.asarray(ref), rtol=5e-5, atol=1e-6), \
        (float(out), float(ref))

    # 2) Larger input exercising the tiled / multi-block path.
    pred2 = jax.random.normal(k3, (8, 4, 80, 80), dtype=jnp.float32) * 2.0
    true2 = (jax.random.uniform(k4, (8, 4, 80, 80)) > 0.7).astype(jnp.float32)
    out2 = jax.block_until_ready(focal_loss(pred2, true2))
    ref2 = focal_loss_reference(pred2, true2)
    assert np.allclose(np.asarray(out2), np.asarray(ref2), rtol=5e-5, atol=1e-6), \
        (float(out2), float(ref2))

    # 3) Odd size (numel not a multiple of 128), bf16 logits, continuous
    #    targets -> exercises the in-kernel tail scrub and in-kernel upcasts.
    pred3 = (jax.random.normal(k5, (3, 3, 33, 21)) * 2.0).astype(jnp.bfloat16)
    true3 = jax.random.uniform(k6, (3, 3, 33, 21), dtype=jnp.float32)
    out3 = jax.block_until_ready(focal_loss(pred3, true3))
    ref3 = focal_loss_reference(pred3, true3)
    assert np.allclose(np.asarray(out3), np.asarray(ref3), rtol=5e-5, atol=1e-6), \
        (float(out3), float(ref3))

    print("KERNEL_OK")
</pallas_src>

<mosaic_0001>
module attributes {stable_mosaic.version = 11 : i64} {
  func.func @_focal_loss_kernel(%arg0: i32, %arg1: i32, %arg2: memref<16x128xf32, #tpu.memory_space<vmem>>, %arg3: memref<16x128xf32, #tpu.memory_space<vmem>>, %arg4: memref<8x128xf32, #tpu.memory_space<vmem>>) attributes {dimension_semantics = [#tpu.dimension_semantics<parallel>, #tpu.dimension_semantics<arbitrary>], iteration_bounds = array<i64: 1, 1>, scalar_prefetch = 0 : i64, scratch_operands = 0 : i64, tpu.core_type = #tpu.core_type<tc>, window_params = [{transform_indices = @transform_0, window_bounds = array<i64: 16, 128>}, {transform_indices = @transform_1, window_bounds = array<i64: 16, 128>}, {transform_indices = @transform_2, window_bounds = array<i64: 8, 128>}]} {
    %c0_i32 = arith.constant 0 : i32
    %0 = arith.cmpi eq, %arg1, %c0_i32 : i32
    %1 = arith.extui %0 : i1 to i32
    %c0_i32_0 = arith.constant 0 : i32
    %2 = arith.cmpi ne, %1, %c0_i32_0 : i32
    scf.if %2 {
      %cst_16 = arith.constant 0.000000e+00 : f32
      %46 = vector.broadcast %cst_16 : f32 to vector<8x128xf32>
      %c0_17 = arith.constant 0 : index
      %c0_18 = arith.constant 0 : index
      %47 = vector.load %arg4[%c0_17, %c0_18] : memref<8x128xf32, #tpu.memory_space<vmem>>, vector<8x128xf32>
      tpu.vector_store %arg4[%c0_17, %c0_18], %46 {strides = array<i32>} : memref<8x128xf32, #tpu.memory_space<vmem>>, vector<8x128xf32>,
    } else {
    }
    %cst = arith.constant 0.000000e+00 : f32
    %3 = vector.broadcast %cst : f32 to vector<8x128xf32>
    %c0_i32_1 = arith.constant 0 : i32
    %c16_i32 = arith.constant 16 : i32
    %4 = arith.muli %c0_i32_1, %c16_i32 : i32
    %5 = tpu.assume_multiple %4, 16 : i32
    %6 = arith.index_cast %5 : i32 to index
    %c0 = arith.constant 0 : index
    %7 = vector.load %arg2[%6, %c0] : memref<16x128xf32, #tpu.memory_space<vmem>>, vector<16x128xf32>
    %8 = arith.index_cast %5 : i32 to index
    %c0_2 = arith.constant 0 : index
    %9 = vector.load %arg3[%8, %c0_2] : memref<16x128xf32, #tpu.memory_space<vmem>>, vector<16x128xf32>
    %10 = math.absf %7 : vector<16x128xf32>
    %cst_3 = arith.constant 0.000000e+00 : f32
    %11 = vector.broadcast %cst_3 : f32 to vector<16x128xf32>
    %12 = arith.subf %11, %10 : vector<16x128xf32>
    %13 = math.exp %12 : vector<16x128xf32>
    %cst_4 = arith.constant 0.000000e+00 : f32
    %14 = vector.broadcast %cst_4 : f32 to vector<16x128xf32>
    %15 = arith.maximumf %7, %14 : vector<16x128xf32>
    %16 = arith.mulf %7, %9 : vector<16x128xf32>
    %17 = arith.subf %15, %16 : vector<16x128xf32>
    %18 = math.log1p %13 : vector<16x128xf32>
    %19 = arith.addf %17, %18 : vector<16x128xf32>
    %cst_5 = arith.constant 5.000000e-01 : f32
    %20 = vector.broadcast %cst_5 : f32 to vector<16x128xf32>
    %21 = arith.mulf %20, %7 : vector<16x128xf32>
    %22 = math.tanh %21 : vector<16x128xf32>
    %cst_6 = arith.constant 5.000000e-01 : f32
    %23 = vector.broadcast %cst_6 : f32 to vector<16x128xf32>
    %24 = arith.mulf %23, %22 : vector<16x128xf32>
    %cst_7 = arith.constant 5.000000e-01 : f32
    %25 = vector.broadcast %cst_7 : f32 to vector<16x128xf32>
    %26 = arith.addf %24, %25 : vector<16x128xf32>
    %27 = arith.addf %9, %26 : vector<16x128xf32>
    %28 = arith.mulf %9, %26 : vector<16x128xf32>
    %cst_8 = arith.constant 2.000000e+00 : f32
    %29 = vector.broadcast %cst_8 : f32 to vector<16x128xf32>
    %30 = arith.mulf %29, %28 : vector<16x128xf32>
    %31 = arith.subf %27, %30 : vector<16x128xf32>
    %cst_9 = arith.constant -5.000000e-01 : f32
    %32 = vector.broadcast %cst_9 : f32 to vector<16x128xf32>
    %33 = arith.mulf %32, %9 : vector<16x128xf32>
    %cst_10 = arith.constant 7.500000e-01 : f32
    %34 = vector.broadcast %cst_10 : f32 to vector<16x128xf32>
    %35 = arith.addf %34, %33 : vector<16x128xf32>
    %36 = math.sqrt %31 : vector<16x128xf32>
    %37 = arith.mulf %31, %36 : vector<16x128xf32>
    %38 = arith.mulf %35, %37 : vector<16x128xf32>
    %39 = arith.mulf %19, %38 : vector<16x128xf32>
    %40 = vector.shape_cast %39 : vector<16x128xf32> to vector<2x8x128xf32>
    %cst_11 = arith.constant dense<0.000000e+00> : vector<8x128xf32>
    %41 = vector.multi_reduction <add>, %40, %cst_11 [0] : vector<2x8x128xf32> to vector<8x128xf32>
    %42 = arith.addf %3, %41 : vector<8x128xf32>
    %c1_i32 = arith.constant 1 : i32
    %c0_12 = arith.constant 0 : index
    %c0_13 = arith.constant 0 : index
    %43 = vector.load %arg4[%c0_12, %c0_13] : memref<8x128xf32, #tpu.memory_space<vmem>>, vector<8x128xf32>
    %44 = arith.addf %43, %42 : vector<8x128xf32>
    %c0_14 = arith.constant 0 : index
    %c0_15 = arith.constant 0 : index
    %45 = vector.load %arg4[%c0_14, %c0_15] : memref<8x128xf32, #tpu.memory_space<vmem>>, vector<8x128xf32>
    tpu.vector_store %arg4[%c0_14, %c0_15], %44 {strides = array<i32>} : memref<8x128xf32, #tpu.memory_space<vmem>>, vector<8x128xf32>,
    return
  }
  func.func @transform_0(%arg0: i32, %arg1: i32) -> (i32, i32) {
    %c0_i32 = arith.constant 0 : i32
    %0 = arith.muli %arg0, %c0_i32 : i32
    %c2_i32 = arith.constant 2 : i32
    %1 = arith.muli %c2_i32, %arg0 : i32
    %c1_i32 = arith.constant 1 : i32
    %2 = arith.subi %c1_i32, %1 : i32
    %3 = arith.muli %arg1, %2 : i32
    %4 = arith.addi %0, %3 : i32
    %c0_i32_0 = arith.constant 0 : i32
    %c0_i32_1 = arith.constant 0 : i32
    return %4, %c0_i32_0 : i32, i32
  }
  func.func @transform_1(%arg0: i32, %arg1: i32) -> (i32, i32) {
    %c0_i32 = arith.constant 0 : i32
    %0 = arith.muli %arg0, %c0_i32 : i32
    %c2_i32 = arith.constant 2 : i32
    %1 = arith.muli %c2_i32, %arg0 : i32
    %c1_i32 = arith.constant 1 : i32
    %2 = arith.subi %c1_i32, %1 : i32
    %3 = arith.muli %arg1, %2 : i32
    %4 = arith.addi %0, %3 : i32
    %c0_i32_0 = arith.constant 0 : i32
    %c0_i32_1 = arith.constant 0 : i32
    return %4, %c0_i32_0 : i32, i32
  }
  func.func @transform_2(%arg0: i32, %arg1: i32) -> (i32, i32) {
    %c0_i32 = arith.constant 0 : i32
    %c0_i32_0 = arith.constant 0 : i32
    return %arg0, %c0_i32 : i32, i32
  }
}

</mosaic_0001>

<bundles_post_ra>
// kernel: tpu_custom_call.1
= control target key start
LH: loop header
LB: loop body
LE: loop exit
PB: predicated region body
PF: predicated region fallthrough
CT: control target
= control target key end

     0   :  { %7 = vsyncpa [#allocation3], 0  ;;  %s303_s0 = inlined_call_operand.hbm [shape: f32[16,128], index: 0, kind: input, shape index: {}]   ;;  %s304_s1 = inlined_call_operand.hbm [shape: f32[16,128], index: 1, kind: input, shape index: {}]   ;;  %s305_s2 = inlined_call_operand.hbm [shape: f32[8,128], index: 2, kind: output, shape index: {}]  }
   0x1   :  { %8 = vsyncpa [#allocation6], 0 }
   0x2   :  { %9 = vsyncpa [#allocation4], 0  ;;  %s256_s9 = smov [#allocation2]  }
   0x3   :  { %s21_s10 = sshll.u32 %s256_s9, 4  ;;  %s22_s10 = int_to_ptr.vmem [resolvable:$true] %s21_s10 }
   0x4   :  { %s198_s11 = scalar_lea.vmem %s22_s10, 256  ;;  %p203_p1 = scmp.lt.s32.totalorder %s22_s10, %s22_s10 }
   0x5   :  { %p199_p0 = scmp.ne.s32.totalorder %s22_s10, %s198_s11  ;;  %p204_p2 = scmp.lt.s32.totalorder %s198_s11, %s198_s11 }
   0x7   :  { %p205_p3 = por %p204_p2, %p203_p1 }
   0x9   :  { %p206_p4 = pnand %p205_p3, %p199_p0 }
   0xb   :  { %209 = shalt.err (!%p206_p4)
}
   0xc   :  { %s257_s12 = smov 128   ;;  %s258_s13 = smov 8  }
   0xd   :  { %27 = dma.hbm_to_vmem [thread:$0]  %s303_s0, 256, %s22_s10, [#allocation3], %s257_s12, %s257_s12, %s258_s13  }
   0xe   :  { %s259_s16 = smov [#allocation5]  }
   0xf   :  { %s39_s17 = sshll.u32 %s259_s16, 4  ;;  %s40_s17 = int_to_ptr.vmem [resolvable:$true] %s39_s17 }
  0x10   :  { %s218_s18 = scalar_lea.vmem %s40_s17, 256  ;;  %p223_p6 = scmp.lt.s32.totalorder %s40_s17, %s40_s17 }
  0x11   :  { %p219_p5 = scmp.ne.s32.totalorder %s40_s17, %s218_s18  ;;  %p224_p7 = scmp.lt.s32.totalorder %s218_s18, %s218_s18 }
  0x13   :  { %p225_p8 = por %p224_p7, %p223_p6 }
  0x15   :  { %p226_p9 = pnand %p225_p8, %p219_p5 }
  0x17   :  { %229 = shalt.err (!%p226_p9)
}
  0x18   :  { %45 = dma.hbm_to_vmem [thread:$0]  %s304_s1, 256, %s40_s17, [#allocation6], %s257_s12, %s257_s12, %s258_s13  }
  0x19   :  { %250 = dma.done.wait [#allocation3], 256  }
  0x1a   :  { %251 = vsyncadd [#allocation3], 4294967040 }
  0x1b   :  { %252 = dma.done.wait [#allocation6], 256  }
  0x1c   :  { %253 = vsyncadd [#allocation6], 4294967040  ;;  %v65_v0 = vld [vmem:[#allocation2] sm:$0xff]  ;;  %v282_v1 = vld [vmem:[#allocation2 + $0x8] sm:$0xff]  ;;  %s260_s0 = smov [#allocation7]  }
  0x1d   :  { %v69_v2 = vand.u32 2147483647, %v65_v0  ;;  %v70_v3 = vand.u32 2147483647, %v282_v1  ;;  %v103_v4 = vmul.f32 0.5, %v65_v0  ;;  %v104_v5 = vmul.f32 0.5, %v282_v1 }
  0x1e   :  { %v67_v17 = vld [vmem:[#allocation5] sm:$0xff]  ;;  %v68_v20 = vld [vmem:[#allocation5 + $0x8] sm:$0xff]  ;;  %v77_v32 = vmax.f32 %v65_v0, 0.0  ;;  %v78_v40 = vmax.f32 %v282_v1, 0.0  ;;  %s154_s1 = sshll.u32 %s260_s0, 4  ;;  %s155_s1 = int_to_ptr.vmem [resolvable:$true] %s154_s1 }
  0x1f   :  { %v71_v6 = vsub.f32 0.0, %v69_v2  ;;  %v72_v7 = vsub.f32 0.0, %v70_v3  ;;  %174 = vtanh.f32 %v103_v4  ;;  %v79_v33 = vmul.f32 %v67_v17, %v65_v0  ;;  %s230_s21 = scalar_lea.vmem %s155_s1, 128  ;;  %p235_p11 = scmp.lt.s32.totalorder %s155_s1, %s155_s1 }
  0x20   :  { %176 = vtanh.f32 %v104_v5  ;;  %v80_v41 = vmul.f32 %v68_v20, %v282_v1  ;;  %v119_v48 = vmul.f32 -0.5, %v67_v17  ;;  %v120_v51 = vmul.f32 -0.5, %v68_v20  ;;  %p231_p10 = scmp.ne.s32.totalorder %s155_s1, %s230_s21  ;;  %p236_p12 = scmp.lt.s32.totalorder %s230_s21, %s230_s21 }
  0x21   :  { %v73_v8 = vmul.f32 1.442695, %v71_v6  ;;  %v75_v9 = vmul.f32 1.442695, %v72_v7  ;;  %v81_v42 = vsub.f32 %v77_v32, %v79_v33 }
  0x22   :  { %v82_v56 = vsub.f32 %v78_v40, %v80_v41  ;;  %v121_v60 = vadd.f32 0.75, %v119_v48  ;;  %v122_v62 = vadd.f32 0.75, %v120_v51  ;;  %p237_p13 = por %p236_p12, %p235_p11 }
  0x23   :  { %178 = vpow2.f32 %v73_v8 }
  0x24   :  { %180 = vpow2.f32 %v75_v9  ;;  %p238_p0 = pnand %p237_p13, %p231_p10 }
  0x2c   :  { %v175_v10 = vpop.eup %174 }
  0x2d   :  { %v177_v11 = vpop.eup %176  ;;  %v107_v12 = vmul.f32 0.5, %v175_v10 }
  0x2e   :  { %v108_v13 = vmul.f32 0.5, %v177_v11 }
  0x2f   :  { %v109_v15 = vadd.f32 0.5, %v107_v12 }
  0x30   :  { %v179_v14 = vpop.eup %178  ;;  %v110_v19 = vadd.f32 0.5, %v108_v13 }
  0x31   :  { %v181_v16 = vpop.eup %180  ;;  %v83_v18 = vadd.f32 1.0, %v179_v14  ;;  %v111_v22 = vadd.f32 %v109_v15, %v67_v17  ;;  %v113_v23 = vmul.f32 %v109_v15, %v67_v17  ;;  %v86_v30 = vmul.f32 -0.5, %v179_v14 }
  0x32   :  { %v92_v21 = vadd.f32 1.0, %v181_v16  ;;  %v112_v24 = vadd.f32 %v110_v19, %v68_v20  ;;  %v114_v25 = vmul.f32 %v110_v19, %v68_v20  ;;  %v95_v31 = vmul.f32 -0.5, %v181_v16 }
  0x33   :  { %182 = vlog2.f32 %v83_v18  ;;  %v115_v26 = vmul.f32 2.0, %v113_v23  ;;  %v87_v34 = vadd.f32 1.0, %v86_v30  ;;  %v89_v36 = vand.u32 2147483647, %v179_v14 }
  0x34   :  { %184 = vlog2.f32 %v92_v21  ;;  %v116_v27 = vmul.f32 2.0, %v114_v25  ;;  %v96_v37 = vadd.f32 1.0, %v95_v31  ;;  %v98_v39 = vand.u32 2147483647, %v181_v16 }
  0x35   :  { %v117_v28 = vsub.f32 %v111_v22, %v115_v26  ;;  %v88_v44 = vmul.f32 %v179_v14, %v87_v34  ;;  %vm288_vm0 = vcmp.lt.f32.partialorder %v89_v36, 0.0004427343 }
  0x36   :  { %v118_v29 = vsub.f32 %v112_v24, %v116_v27  ;;  %v97_v47 = vmul.f32 %v181_v16, %v96_v37  ;;  %vm292_vm1 = vcmp.lt.f32.partialorder %v98_v39, 0.0004427343 }
  0x37   :  { %186 = vrsqrt.f32 %v117_v28  ;;  %vm125_vm2 = vcmp.eq.f32.partialorder %v117_v28, inf  ;;  %v128_v52 = vand.u32 2147483648, %v117_v28  ;;  %vm127_vm3 = vcmp.eq.f32.partialorder %v117_v28, 0.0 }
  0x38   :  { %188 = vrsqrt.f32 %v118_v29  ;;  %vm132_vm4 = vcmp.eq.f32.partialorder %v118_v29, inf  ;;  %v135_v55 = vand.u32 2147483648, %v118_v29  ;;  %vm134_vm5 = vcmp.eq.f32.partialorder %v118_v29, 0.0 }
  0x40   :  { %v183_v35 = vpop.eup %182 }
  0x41   :  { %v185_v38 = vpop.eup %184  ;;  %v85_v43 = vmul.f32 0.6931472, %v183_v35 }
  0x42   :  { %v94_v46 = vmul.f32 0.6931472, %v185_v38 }
  0x43   :  { %v91_v57 = vsel %vm288_vm0, %v88_v44, %v85_v43 }
  0x44   :  { %v187_v49 = vpop.eup %186  ;;  %v100_v59 = vsel %vm292_vm1, %v97_v47, %v94_v46  ;;  %v101_v1 = vadd.f32 %v91_v57, %v81_v42 }
  0x45   :  { %v189_v53 = vpop.eup %188  ;;  %v124_v54 = vmul.f32 %v187_v49, %v117_v28  ;;  %v102_v4 = vadd.f32 %v100_v59, %v82_v56 }
  0x46   :  { %v131_v58 = vmul.f32 %v189_v53, %v118_v29 }
  0x47   :  { %v126_v61 = vsel %vm125_vm2, %v117_v28, %v124_v54 }
  0x48   :  { %v129_v63 = vsel %vm127_vm3, %v128_v52, %v126_v61  ;;  %v133_v0 = vsel %vm132_vm4, %v118_v29, %v131_v58 }
  0x49   :  { %v136_v2 = vsel %vm134_vm5, %v135_v55, %v133_v0  ;;  %v137_v3 = vmul.f32 %v129_v63, %v117_v28 }
  0x4a   :  { %v138_v5 = vmul.f32 %v136_v2, %v118_v29 }
  0x4b   :  { %v139_v6 = vmul.f32 %v137_v3, %v121_v60 }
  0x4c   :  { %v140_v7 = vmul.f32 %v138_v5, %v122_v62 }
  0x4d   :  { %v141_v8 = vmul.f32 %v139_v6, %v101_v1 }
  0x4e   :  { %v142_v9 = vmul.f32 %v140_v7, %v102_v4 }
  0x50   :  { %v143_v10 = vadd.f32 %v142_v9, %v141_v8 }
  0x52   :  { %147 = vst [vmem:[#allocation7] sm:$0xff] %v143_v10 }
  0x53   :  { %241 = shalt.err (!%p238_p0)
}
  0x54   :  { %157 = dma.vmem_to_hbm [thread:$0]  %s155_s1, 128, %s305_s2, [#allocation4]  }
  0x55   :  { %254 = dma.done.wait [#allocation4], 128  }
  0x56   :  { %255 = vsyncadd [#allocation4], 4294967168 }
  0x57   :  { %161 = vsyncpa [#allocation3], 1 }
  0x58   :  { %162 = vsyncpa [#allocation6], 1 }
  0x59   :  { %163 = vsyncpa [#allocation4], 1 }

</bundles_post_ra>
